<compile_context>
chip_gen: v7x
topology: tpu7x:2x2x1
jax: 0.10.0
libtpu: 0.0.40
codegen_flags: <defaults>
</compile_context>

<pallas_src>
import functools
import math

import jax
import jax.numpy as jnp
from jax import lax
from jax.experimental import pallas as pl
from jax.experimental.pallas import tpu as pltpu


def _round_up(x, m):
    return ((x + m - 1) // m) * m


def _arcface_kernel(x_ref, w_ref, inv_x_ref, inv_w_ref, label_ref, out_ref, *,
                    s, s_cos_m, s_sin_m, s_mm, th, easy_margin, tile_n):
    # x_ref:     (tile_b, D)       raw batch tile (MXU dtype)
    # w_ref:     (tile_n, D)       raw class tile (MXU dtype)
    # inv_x_ref: (tile_b, 1) f32   1 / max(||x||, eps)
    # inv_w_ref: (1, tile_n) f32   1 / max(||w||, eps)
    # label_ref: (tile_b, 1) i32   labels for the batch tile
    # out_ref:   (tile_b, tile_n)  logits tile

    # Raw dot on the MXU, f32 accumulate: (tile_b, D) x (tile_n, D)^T.
    raw = lax.dot_general(
        x_ref[...], w_ref[...],
        dimension_numbers=(((1,), (1,)), ((), ())),
        preferred_element_type=jnp.float32,
    )

    # Post-matmul normalization: cosine = raw * inv||x|| * inv||w||.
    cosine = (raw * inv_x_ref[...]) * inv_w_ref[...]

    # Margin math in f32 with s folded into the constants.
    sine = jnp.sqrt(jnp.maximum(1.0 - cosine * cosine, 0.0))
    phi_s = cosine * s_cos_m - sine * s_sin_m        # == phi * s
    cosine_s = cosine * s
    if easy_margin:
        sel = jnp.where(cosine > 0.0, phi_s, cosine_s)
    else:
        sel = jnp.where(cosine > th, phi_s, cosine_s - s_mm)

    # one-hot via column-index comparison (equivalent of scatter_); the
    # col_base offset is applied to the (tile_b, 1) label operand, not the
    # full (tile_b, tile_n) iota.
    col_base = pl.program_id(1) * tile_n
    col_ids = lax.broadcasted_iota(jnp.int32, cosine.shape, 1)
    one_hot = col_ids == (label_ref[...] - col_base)

    out_ref[...] = jnp.where(one_hot, sel, cosine_s).astype(out_ref.dtype)


def arc_margin_product(x, weight, label, *, s=32.0, m=0.5, easy_margin=False,
                       tile_n=512, tile_b=None, mxu_dtype=None, eps=1e-12):
    """ArcFace margin logits.

    x: (B, D) float, weight: (N, D) float32 or bfloat16 (bf16 halves the
    dominant HBM stream and uses the fast MXU path), label: (B,) integer
    class ids.  Returns (B, N) float32 logits.

    mxu_dtype: dtype fed to the MXU (defaults to weight.dtype).  On v5e,
    passing jnp.bfloat16 here even with f32 weights avoids the slow f32 MXU
    emulation; margin math stays f32 either way.
    """
    B, D = x.shape
    N, D2 = weight.shape
    assert D == D2

    # Class tiles: large 128-lane multiples (lane-dense unmasked stores,
    # full MXU width), never wider than the padded N.
    tile_n = int(min(tile_n, _round_up(N, 128)))
    tile_n = int(_round_up(tile_n, 128))
    # Batch tiles: multiples of 8 sublanes, capped at 512 so (a) VMEM stays
    # comfortable on v5e's 16 MiB scoped default and (b) large batches still
    # produce >=2 batch tiles for v7x megacore sharding.
    if tile_b is None:
        tile_b = min(512, int(_round_up(B, 8)))
    tile_b = int(_round_up(tile_b, 8))

    B_pad = int(_round_up(B, tile_b))
    N_pad = int(_round_up(N, tile_n))

    if mxu_dtype is None:
        mxu_dtype = weight.dtype

    # Inverse norms precomputed once in f32 (matches F.normalize's
    # 1 / max(||v||, eps) clamp via rsqrt(max(sum_sq, eps^2))).
    x_f32 = x.astype(jnp.float32)
    w_f32 = weight.astype(jnp.float32)
    inv_x = lax.rsqrt(jnp.maximum(jnp.sum(x_f32 * x_f32, axis=-1, keepdims=True),
                                  eps * eps))                       # (B, 1)
    inv_w = lax.rsqrt(jnp.maximum(jnp.sum(w_f32 * w_f32, axis=-1),
                                  eps * eps)).reshape(1, N)         # (1, N)

    x_p = x.astype(mxu_dtype)
    w_p = weight.astype(mxu_dtype)
    lab_p = label.astype(jnp.int32).reshape(B, 1)

    if B_pad != B:
        x_p = jnp.pad(x_p, ((0, B_pad - B), (0, 0)))
        inv_x = jnp.pad(inv_x, ((0, B_pad - B), (0, 0)))
        lab_p = jnp.pad(lab_p, ((0, B_pad - B), (0, 0)), constant_values=-1)
    if N_pad != N:
        w_p = jnp.pad(w_p, ((0, N_pad - N), (0, 0)))
        inv_w = jnp.pad(inv_w, ((0, 0), (0, N_pad - N)))

    cos_m = math.cos(m)
    sin_m = math.sin(m)
    th = math.cos(math.pi - m)
    mm = math.sin(math.pi - m) * m

    kernel = functools.partial(
        _arcface_kernel,
        s=s, s_cos_m=s * cos_m, s_sin_m=s * sin_m, s_mm=s * mm, th=th,
        easy_margin=easy_margin, tile_n=tile_n,
    )

    # Explicit VMEM budget: 2x (double-buffered) every block + slack.  v5e's
    # scoped default is 16 MiB; stay within v7x's 64 MiB physical VMEM.
    itemsize = jnp.dtype(mxu_dtype).itemsize
    block_bytes = (tile_b * D * itemsize          # x tile
                   + tile_n * D * itemsize        # weight tile
                   + tile_b * 4 + tile_n * 4      # inv_x, inv_w tiles
                   + tile_b * 4                   # label tile
                   + tile_b * tile_n * 4)         # output tile
    vmem_limit_bytes = int(min(64 << 20, max(16 << 20, 2 * block_bytes + (4 << 20))))

    cost = pl.CostEstimate(
        flops=2 * B_pad * N_pad * D,
        transcendentals=B_pad * N_pad,            # sqrt per logit
        bytes_accessed=(x_p.size * itemsize + w_p.size * itemsize
                        + B_pad * N_pad * 4
                        + inv_x.size * 4 + inv_w.size * 4 + lab_p.size * 4),
    )

    out = pl.pallas_call(
        kernel,
        out_shape=jax.ShapeDtypeStruct((B_pad, N_pad), jnp.float32),
        grid_spec=pltpu.PrefetchScalarGridSpec(
            num_scalar_prefetch=0,
            grid=(B_pad // tile_b, N_pad // tile_n),
            in_specs=[
                pl.BlockSpec((tile_b, D), lambda b, j: (b, 0)),       # x
                pl.BlockSpec((tile_n, D), lambda b, j: (j, 0)),       # weight
                pl.BlockSpec((tile_b, 1), lambda b, j: (b, 0)),       # inv_x
                pl.BlockSpec((1, tile_n), lambda b, j: (0, j)),       # inv_w
                pl.BlockSpec((tile_b, 1), lambda b, j: (b, 0)),       # labels
            ],
            out_specs=pl.BlockSpec((tile_b, tile_n), lambda b, j: (b, j)),
        ),
        compiler_params=pltpu.CompilerParams(
            # No cross-iteration state left, so both axes can be sharded
            # across TensorCores (v7x megacore) regardless of batch size.
            dimension_semantics=("parallel", "parallel"),
            vmem_limit_bytes=vmem_limit_bytes,
        ),
        cost_estimate=cost,
    )(x_p, w_p, inv_x, inv_w, lab_p)

    if B_pad != B or N_pad != N:
        out = out[:B, :N]
    return out


def _reference(x, weight, label, *, s=32.0, m=0.5, easy_margin=False):
    # Pure-JAX reference of the PyTorch forward.
    eps = 1e-12
    xn = x / jnp.maximum(jnp.linalg.norm(x, axis=1, keepdims=True), eps)
    wn = weight / jnp.maximum(jnp.linalg.norm(weight, axis=1, keepdims=True), eps)
    cosine = xn @ wn.T
    sine = jnp.sqrt(jnp.maximum(1.0 - cosine ** 2, 0.0))
    cos_m, sin_m = math.cos(m), math.sin(m)
    th, mm = math.cos(math.pi - m), math.sin(math.pi - m) * m
    phi = cosine * cos_m - sine * sin_m
    if easy_margin:
        phi = jnp.where(cosine > 0, phi, cosine)
    else:
        phi = jnp.where(cosine - th > 0, phi, cosine - mm)
    one_hot = jax.nn.one_hot(label, cosine.shape[1], dtype=cosine.dtype)
    return (one_hot * phi + (1.0 - one_hot) * cosine) * s


if __name__ == "__main__":
    # Small deterministic setup.  out_feature is deliberately NOT a multiple of
    # the class tile, exercising the padding path (like the real default 10575).
    B = 8
    in_feature = 128
    out_feature = 1000

    key = jax.random.PRNGKey(0)
    kx, kw, kl = jax.random.split(key, 3)

    x = jax.random.normal(kx, (B, in_feature), dtype=jnp.float32)

    # xavier_uniform_ for a (out_feature, in_feature) weight:
    limit = math.sqrt(6.0 / (in_feature + out_feature))
    weight = jax.random.uniform(kw, (out_feature, in_feature),
                                dtype=jnp.float32, minval=-limit, maxval=limit)

    label = jax.random.randint(kl, (B,), 0, out_feature, dtype=jnp.int32)

    # f32 path: must match the reference tightly.
    out = arc_margin_product(x, weight, label, s=32.0, m=0.5, easy_margin=False)
    out = jax.block_until_ready(out)

    ref = _reference(x, weight, label, s=32.0, m=0.5, easy_margin=False)
    assert out.shape == (B, out_feature)
    assert jnp.allclose(out, ref, atol=1e-4, rtol=1e-4), "f32 mismatch vs reference"

    # easy_margin variant.
    out_em = arc_margin_product(x, weight, label, s=32.0, m=0.5, easy_margin=True)
    ref_em = _reference(x, weight, label, s=32.0, m=0.5, easy_margin=True)
    out_em = jax.block_until_ready(out_em)
    assert jnp.allclose(out_em, ref_em, atol=1e-4, rtol=1e-4), "easy_margin mismatch"

    # bf16-weight path: halves the dominant HBM stream; cosine precision
    # ~1e-2 on s=32 logits, so compare with a loose absolute tolerance.
    out_bf16 = arc_margin_product(x, weight.astype(jnp.bfloat16), label,
                                  s=32.0, m=0.5, easy_margin=False)
    out_bf16 = jax.block_until_ready(out_bf16)
    assert out_bf16.shape == (B, out_feature)
    assert float(jnp.max(jnp.abs(out_bf16 - ref))) < 0.5, "bf16 path out of tolerance"

    print("KERNEL_OK")
</pallas_src>

<mosaic_0001>
module attributes {stable_mosaic.version = 11 : i64} {
  func.func @_arcface_kernel(%arg0: i32, %arg1: i32, %arg2: memref<8x128xf32, #tpu.memory_space<vmem>>, %arg3: memref<512x128xf32, #tpu.memory_space<vmem>>, %arg4: memref<8x1xf32, #tpu.memory_space<vmem>>, %arg5: memref<1x512xf32, #tpu.memory_space<vmem>>, %arg6: memref<8x1xi32, #tpu.memory_space<vmem>>, %arg7: memref<8x512xf32, #tpu.memory_space<vmem>>) attributes {dimension_semantics = [#tpu.dimension_semantics<parallel>, #tpu.dimension_semantics<parallel>], iteration_bounds = array<i64: 1, 2>, scalar_prefetch = 0 : i64, scratch_operands = 0 : i64, tpu.core_type = #tpu.core_type<tc>, window_params = [{transform_indices = @transform_0, window_bounds = array<i64: 8, 128>}, {transform_indices = @transform_1, window_bounds = array<i64: 512, 128>}, {transform_indices = @transform_2, window_bounds = array<i64: 8, 1>}, {transform_indices = @transform_3, window_bounds = array<i64: 1, 512>}, {transform_indices = @transform_4, window_bounds = array<i64: 8, 1>}, {transform_indices = @transform_5, window_bounds = array<i64: 8, 512>}]} {
    %c0 = arith.constant 0 : index
    %c0_0 = arith.constant 0 : index
    %0 = vector.load %arg2[%c0, %c0_0] : memref<8x128xf32, #tpu.memory_space<vmem>>, vector<8x128xf32>
    %c0_1 = arith.constant 0 : index
    %c0_2 = arith.constant 0 : index
    %1 = vector.load %arg3[%c0_1, %c0_2] : memref<512x128xf32, #tpu.memory_space<vmem>>, vector<512x128xf32>
    %cst = arith.constant dense<0.000000e+00> : vector<8x512xf32>
    %2 = tpu.matmul %0, %1, %cst {dimension_numbers = #tpu.dot_dimension_numbers<[1], [1], [0], [0], [0, 0, 1, 0], [], []>} : vector<8x128xf32>, vector<512x128xf32>, vector<8x512xf32> -> vector<8x512xf32>
    %c0_3 = arith.constant 0 : index
    %c0_4 = arith.constant 0 : index
    %3 = vector.load %arg4[%c0_3, %c0_4] : memref<8x1xf32, #tpu.memory_space<vmem>>, vector<8x1xf32>
    %4 = vector.broadcast %3 : vector<8x1xf32> to vector<8x512xf32>
    %5 = arith.mulf %2, %4 : vector<8x512xf32>
    %c0_5 = arith.constant 0 : index
    %c0_6 = arith.constant 0 : index
    %6 = vector.load %arg5[%c0_5, %c0_6] : memref<1x512xf32, #tpu.memory_space<vmem>>, vector<1x512xf32>
    %7 = vector.broadcast %6 : vector<1x512xf32> to vector<8x512xf32>
    %8 = arith.mulf %5, %7 : vector<8x512xf32>
    %9 = arith.mulf %8, %8 : vector<8x512xf32>
    %cst_7 = arith.constant 1.000000e+00 : f32
    %10 = vector.broadcast %cst_7 : f32 to vector<8x512xf32>
    %11 = arith.subf %10, %9 : vector<8x512xf32>
    %cst_8 = arith.constant 0.000000e+00 : f32
    %12 = vector.broadcast %cst_8 : f32 to vector<8x512xf32>
    %13 = arith.maximumf %11, %12 : vector<8x512xf32>
    %14 = math.sqrt %13 : vector<8x512xf32>
    %cst_9 = arith.constant 28.0826416 : f32
    %15 = vector.broadcast %cst_9 : f32 to vector<8x512xf32>
    %16 = arith.mulf %8, %15 : vector<8x512xf32>
    %cst_10 = arith.constant 15.3416176 : f32
    %17 = vector.broadcast %cst_10 : f32 to vector<8x512xf32>
    %18 = arith.mulf %14, %17 : vector<8x512xf32>
    %19 = arith.subf %16, %18 : vector<8x512xf32>
    %cst_11 = arith.constant 3.200000e+01 : f32
    %20 = vector.broadcast %cst_11 : f32 to vector<8x512xf32>
    %21 = arith.mulf %8, %20 : vector<8x512xf32>
    %cst_12 = arith.constant -0.87758255 : f32
    %22 = vector.broadcast %cst_12 : f32 to vector<8x512xf32>
    %23 = arith.cmpf ogt, %8, %22 : vector<8x512xf32>
    %cst_13 = arith.constant 7.67080879 : f32
    %24 = vector.broadcast %cst_13 : f32 to vector<8x512xf32>
    %25 = arith.subf %21, %24 : vector<8x512xf32>
    %26 = arith.select %23, %19, %25 : vector<8x512xi1>, vector<8x512xf32>
    %c512_i32 = arith.constant 512 : i32
    %27 = arith.muli %arg1, %c512_i32 : i32
    %28 = tpu.iota {dimensions = array<i32: 1>} : vector<8x512xi32>
    %c0_14 = arith.constant 0 : index
    %c0_15 = arith.constant 0 : index
    %29 = vector.load %arg6[%c0_14, %c0_15] : memref<8x1xi32, #tpu.memory_space<vmem>>, vector<8x1xi32>
    %30 = vector.broadcast %27 : i32 to vector<8x1xi32>
    %31 = arith.subi %29, %30 : vector<8x1xi32>
    %32 = vector.broadcast %31 : vector<8x1xi32> to vector<8x512xi32>
    %33 = arith.cmpi eq, %28, %32 : vector<8x512xi32>
    %34 = arith.select %33, %26, %21 : vector<8x512xi1>, vector<8x512xf32>
    %c0_16 = arith.constant 0 : index
    %c0_17 = arith.constant 0 : index
    %35 = vector.load %arg7[%c0_16, %c0_17] : memref<8x512xf32, #tpu.memory_space<vmem>>, vector<8x512xf32>
    tpu.vector_store %arg7[%c0_16, %c0_17], %34 {strides = array<i32>} : memref<8x512xf32, #tpu.memory_space<vmem>>, vector<8x512xf32>,
    return
  }
  func.func @transform_0(%arg0: i32, %arg1: i32) -> (i32, i32) {
    %c0_i32 = arith.constant 0 : i32
    %c0_i32_0 = arith.constant 0 : i32
    return %arg0, %c0_i32 : i32, i32
  }
  func.func @transform_1(%arg0: i32, %arg1: i32) -> (i32, i32) {
    %c0_i32 = arith.constant 0 : i32
    %c0_i32_0 = arith.constant 0 : i32
    return %arg1, %c0_i32 : i32, i32
  }
  func.func @transform_2(%arg0: i32, %arg1: i32) -> (i32, i32) {
    %c0_i32 = arith.constant 0 : i32
    %c0_i32_0 = arith.constant 0 : i32
    return %arg0, %c0_i32 : i32, i32
  }
  func.func @transform_3(%arg0: i32, %arg1: i32) -> (i32, i32) {
    %c0_i32 = arith.constant 0 : i32
    %c0_i32_0 = arith.constant 0 : i32
    return %c0_i32, %arg1 : i32, i32
  }
  func.func @transform_4(%arg0: i32, %arg1: i32) -> (i32, i32) {
    %c0_i32 = arith.constant 0 : i32
    %c0_i32_0 = arith.constant 0 : i32
    return %arg0, %c0_i32 : i32, i32
  }
  func.func @transform_5(%arg0: i32, %arg1: i32) -> (i32, i32) {
    %c0_i32 = arith.constant 0 : i32
    return %arg0, %arg1 : i32, i32
  }
}

</mosaic_0001>

<bundles_post_ra>
// kernel: tpu_custom_call.1
= control target key start
LH: loop header
LB: loop body
LE: loop exit
PB: predicated region body
PF: predicated region fallthrough
CT: control target
= control target key end

     0   :  { %10 = vsyncpa [#allocation3], 0  ;;  %s1513_s0 = inlined_call_operand.vmem [shape: f32[8,128], index: 0, kind: input, shape index: {}]   ;;  %s1514_s1 = inlined_call_operand.hbm [shape: f32[1024,128], index: 1, kind: input, shape index: {}]   ;;  %s1515_s2 = inlined_call_operand.vmem [shape: f32[8,1], index: 2, kind: input, shape index: {}]   ;;  %s1516_s3 = inlined_call_operand.vmem [shape: f32[1,1024], index: 3, kind: input, shape index: {}]   ;;  %s1517_s4 = inlined_call_operand.vmem [shape: s32[8,1], index: 4, kind: input, shape index: {}]   ;;  %s1518_s5 = inlined_call_operand.hbm [shape: f32[8,1024], index: 5, kind: output, shape index: {}]  }
   0x1   :  { %12 = vsyncpa [#allocation3 + $0x1], 0 }
   0x2   :  { %13 = vsyncpa [#allocation4], 0 }
   0x3   :  { %15 = vsyncpa [#allocation4 + $0x1], 0  ;;  %s1197_s18 = smov 0   ;;  %s1199_s19 = smov 0  }
   0x4   :  { %s1201_s20 = smov 0   ;;  %s1203_s21 = smov 0  }
   0x5   :  { %s1205_s22 = smov 0   ;;  %s1207_s23 = smov 0  }
   0x6 LB: > { %s816_s24 = sadd.s32 4294967295, %s1160_s23   ;;  %s817_s25 = sadd.s32 4294967294, %s1160_s23   ;;  %s1160_s23 = sphi %s1207_s23, %s21_s23   ;;  %s1156_s22 = sphi %s1205_s22, %s1533_s22   ;;  %s1152_s21 = sphi %s1203_s21, %s1532_s21   ;;  %s1148_s20 = sphi %s1201_s20, %s1531_s20   ;;  %s1144_s19 = sphi %s1199_s19, %s1530_s19   ;;  %s1140_s18 = sphi %s1197_s18, %s1529_s18  }
   0x7   : > { %s30_s26 = sadd.s32 1, %s1156_s22  ;;  %s66_s27 = sadd.s32 1, %s1148_s20 }
   0x8   : > { %p31_p0 = scmp.ge.s32.totalorder %s30_s26, 2  ;;  %p73_p1 = scmp.ne.s32.totalorder %s1148_s20, %s1144_s19 }
   0x9   : > { %p74_p2 = scmp.eq.s32.totalorder %s1160_s23, 0  ;;  %p79_p3 = scmp.ne.s32.totalorder %s1144_s19, %s1140_s18 }
   0xa   : > { %s1535_s26 = smov (%p31_p0, %s30_s26), 0  ;;  %p80_p5 = scmp.eq.s32.totalorder %s816_s24, 0 }
   0xb   : > { %p1238_p4 = por %p74_p2, %p73_p1  ;;  %s63_s29 = ssub.s32 %s1156_s22, %s1535_s26 }
   0xc   : > { %p183_p6 = scmp.eq.s32.totalorder %s816_s24, 1  ;;  %p64_p7 = scmp.eq.s32.totalorder %s63_s29, 0 }
   0xd   : > { %p1244_p8 = por %p80_p5, %p79_p3  ;;  %p189_p10 = scmp.eq.s32.totalorder %s817_s25, 1 }
   0xe   : > { %p1248_p9 = por %p183_p6, %p73_p1  ;;  %p986_p13 = scmp.lt.s32.totalorder %s1160_s23, 2 }
   0xf   : > { %s1253_s7 = scalar_select %p64_p7, %s1148_s20, %s66_s27  }
  0x10   : > { %s1522_s6 = scalar_select %p1248_p9, 1, 0 }
  0x11   : > { %p1255_p11 = por %p189_p10, %p79_p3  ;;  %s230_s9 = sand.u32 1, %s1148_s20  }
  0x12   : > { %s823_s10 = sshll.u32 %s230_s9, 9  ;;  %s840_s11 = sshll.u32 %s1156_s22, 13 }
  0x13   : > { %s1523_s8 = scalar_select %p1255_p11, 1, 0 }
  0x14   : > { %s1266_s14 = scalar_lea.hbm %s1514_s1, %s840_s11  ;;  %s234_s15 = scalar_lea.vmem [#allocation2], %s823_s10 }
  0x15   : > { %s241_s16 = sshll.u32 %s234_s15, 4  ;;  %p1272_p0 = pnand %p986_p13, %p1238_p4  ;;  %s1268_s16 = int_to_ptr.vmem [resolvable:$true] %s241_s16 }
  0x16   : > { %s1277_s24 = scalar_lea.sflag [#allocation3], %s230_s9  ;;  %s1048_s25 = scalar_lea.hbm %s1266_s14, 8192 }
  0x17   : > { %p1049_p2 = scmp.ne.s32.totalorder %s1266_s14, %s1048_s25  ;;  %p1050_p3 = pneg %p1272_p0 }
  0x18   : > { %s1053_s28 = scalar_lea.hbm %s1514_s1, 16384  ;;  %p1054_p4 = scmp.lt.u32.totalorder %s1266_s14, %s1514_s1 }
  0x19   : > { %p1051_p5 = pnand %p1050_p3, %p1049_p2  ;;  %p1055_p7 = scmp.lt.u32.totalorder %s1053_s28, %s1048_s25 }
  0x1a   : > { %p1057_p13 = scmp.lt.u32.totalorder %s1048_s25, %s1266_s14 }
  0x1b   : > { %p1052_p6 = pneg %p1051_p5  ;;  %p1056_p10 = por %p1055_p7, %p1054_p4 }
  0x1d   : > { %p1058_p12 = por %p1057_p13, %p1056_p10 }
  0x1f   : > { %p1059_p1 = pnand %p1058_p12, %p1052_p6 }
  0x21   : > { %1062 = shalt.err (!%p1059_p1)
}
  0x22   : > { %s1063_s9 = scalar_lea.vmem %s1268_s16, 8192  ;;  %s1162_s12 = smov [#allocation2]  }
  0x23   : > { %p1064_p2 = scmp.ne.s32.totalorder %s1268_s16, %s1063_s9  ;;  %s1068_s13 = sshll.u32 %s1162_s12, 4  ;;  %s1069_s13 = int_to_ptr.vmem [resolvable:$false] %s1068_s13 }
  0x24   : > { %s1070_s15 = scalar_lea.vmem %s1069_s13, 16384  ;;  %p1071_p9 = scmp.lt.s32.totalorder %s1268_s16, %s1069_s13 }
  0x25   : > { %p1066_p5 = pnand %p1064_p2, %p1050_p3  ;;  %p1072_p4 = scmp.lt.s32.totalorder %s1070_s15, %s1063_s9 }
  0x27   : > { %p1067_p11 = pneg %p1066_p5  ;;  %p1073_p7 = por %p1072_p4, %p1071_p9 }
  0x29   : > { %p1074_p10 = pnand %p1073_p7, %p1067_p11 }
  0x2b   : > { %1077 = shalt.err (!%p1074_p10)
}
  0x2c   : > { %s1163_s25 = smov 128   ;;  %s1164_s27 = smov 8  }
  0x2d   : > { %981 = dma.hbm_to_vmem [thread:$0]  (!%p1272_p0), %s1266_s14, 8192, %s1268_s16, %s1277_s24, %s1163_s25, %s1163_s25, %s1164_s27  }
  0x2e   : > { %p257_p12 = scmp.lt.s32.totalorder %s1160_s23, 3  ;;  %p1525_p1 = scmp.ge.s32.totalorder %s1160_s23, 1 }
  0x30   : > { %p258_p3 = pnand %p1525_p1, %p257_p12 }
  0x31   : > { %s1309_s29 = sand.u32 (!%p258_p3), 1, %s1144_s19  }
  0x32   : > { %261 = sbr.rel (%p258_p3) target bundleno = 386 (0x182), region = 40  ;;  %s827_s28 = sshll.u32 (!%p258_p3), %s1309_s29, 9 }
  0x33   : > { %s264_s10 = scalar_lea.sflag (!%p258_p3), [#allocation3], %s1309_s29  ;;  %s1313_s11 = scalar_lea.vmem (!%p258_p3), [#allocation2], %s827_s28 }
  0x39   : > { %1131 = dma.done.wait (%p1244_p8), %s264_s10, 8192  }
  0x3a   : > { %1133 = vsyncadd (%p1244_p8), %s264_s10, 4294959104  ;;  %v1165_v0 = vmov 0   ;;  %v346_v1 = vld [vmem:[%s1313_s11 + $0x80] sm:$0xff]  ;;  %v347_v2 = vld [vmem:[%s1313_s11 + $0x88] sm:$0xff]  ;;  %s834_s30 = sshll.u32 %s1152_s21, 9  ;;  %s829_s13 = sshll.u32 %s1152_s21, 2 }
  0x3b   : > { %1039 = vset.pattern.permute.xlu0 %v1165_v0  ;;  %v378_v3 = vld [vmem:[%s1313_s11 + $0x180] sm:$0xff]  ;;  %v910_v4 = vpack.c.bf16 %v347_v2, %v346_v1  ;;  %v379_v5 = vld [vmem:[%s1313_s11 + $0x188] sm:$0xff]  ;;  %v348_v12 = vld [vmem:[%s1313_s11 + $0x90] sm:$0xff]  ;;  %v647_v46 = vstv %s834_s30  ;;  %p320_p8 = scmp.lt.s32.totalorder %s829_s13, 7  ;;  %s828_s28 = sshll.u32 %s1309_s29, 5 }
  0x3c   : > { %v330_v6 = vld [vmem:[%s1313_s11] sm:$0xff]  ;;  %v331_v7 = vld [vmem:[%s1313_s11 + $0x8] sm:$0xff]  ;;  %v942_v8 = vpack.c.bf16 %v379_v5, %v378_v3  ;;  %v349_v14 = vld [vmem:[%s1313_s11 + $0x98] sm:$0xff]  ;;  %s309_s10 = scalar_lea.vmem [#allocation5], %s828_s28  ;;  %s1462_s17 = scalar_lea.hbm %s1518_s5, %s834_s30 }
  0x3d   : > { %v912_v9 = vpack.c.bf16 %v331_v7, %v330_v6  ;;  %v362_v10 = vld [vmem:[%s1313_s11 + $0x100] sm:$0xff]  ;;  %v363_v11 = vld [vmem:[%s1313_s11 + $0x108] sm:$0xff]  ;;  %911 = vmatprep.subr.bf16.mxu0 %v910_v4  ;;  %v380_v15 = vld [vmem:[%s1313_s11 + $0x190] sm:$0xff]  ;;  %v914_v17 = vpack.c.bf16 %v349_v14, %v348_v12  ;;  %s1537_s13 = smov (!%p320_p8, %s829_s13), 7  ;;  %s665_s24 = scalar_lea.sflag [#allocation4], %s1309_s29 }
  0x3e   : > { %v944_v13 = vpack.c.bf16 %v363_v11, %v362_v10  ;;  %v381_v16 = vld [vmem:[%s1313_s11 + $0x198] sm:$0xff]  ;;  %943 = vmatprep.subr.bf16.mxu1 %v942_v8  ;;  %v332_v19 = vld [vmem:[%s1313_s11 + $0x10] sm:$0xff]  ;;  %v350_v23 = vld [vmem:[%s1313_s11 + $0xa0] sm:$0xff]  ;;  %s322_s27 = scalar_lea.vmem %s1516_s3, %s1537_s13  ;;  %p1526_p11 = scmp.ne.s32.totalorder %s1522_s6, 0 }
  0x3f   : > { %913 = vmatpush3.bf16.xpose.msra.mxu0 %v912_v9  ;;  %v946_v18 = vpack.c.bf16 %v381_v16, %v380_v15  ;;  %v333_v20 = vld [vmem:[%s1313_s11 + $0x18] sm:$0xff]  ;;  %v364_v21 = vld [vmem:[%s1313_s11 + $0x110] sm:$0xff]  ;;  %v351_v24 = vld [vmem:[%s1313_s11 + $0xa8] sm:$0xff]  ;;  %s1166_s21 = smov [#allocation5]  }
  0x40   : > { %945 = vmatpush3.bf16.xpose.msra.mxu1 %v944_v13  ;;  %915 = vmatprep.subr.bf16.mxu0 %v914_v17  ;;  %v365_v22 = vld [vmem:[%s1313_s11 + $0x118] sm:$0xff]  ;;  %v382_v25 = vld [vmem:[%s1313_s11 + $0x1a0] sm:$0xff]  ;;  %v383_v26 = vld [vmem:[%s1313_s11 + $0x1a8] sm:$0xff]  ;;  %v916_v27 = vpack.c.bf16 %v333_v20, %v332_v19  ;;  %v918_v29 = vpack.c.bf16 %v351_v24, %v350_v23  ;;  %s1082_s30 = sshll.u32 %s1166_s21, 4  ;;  %s1083_s30 = int_to_ptr.vmem [resolvable:$false] %s1082_s30 }
  0x41   : > { %947 = vmatprep.subr.bf16.mxu1 %v946_v18  ;;  %v948_v28 = vpack.c.bf16 %v365_v22, %v364_v21  ;;  %v950_v30 = vpack.c.bf16 %v383_v26, %v382_v25  ;;  %v334_v31 = vld [vmem:[%s1313_s11 + $0x20] sm:$0xff]  ;;  %v335_v32 = vld [vmem:[%s1313_s11 + $0x28] sm:$0xff]  ;;  %v352_v35 = vld [vmem:[%s1313_s11 + $0xb0] sm:$0xff]  ;;  %s1084_s12 = scalar_lea.vmem %s1083_s30, 1024 }
  0x42   : > { %v366_v33 = vld [vmem:[%s1313_s11 + $0x120] sm:$0xff]  ;;  %v367_v34 = vld [vmem:[%s1313_s11 + $0x128] sm:$0xff]  ;;  %v353_v36 = vld [vmem:[%s1313_s11 + $0xb8] sm:$0xff]  ;;  %v920_v39 = vpack.c.bf16 %v335_v32, %v334_v31 }
  0x43   : > { %v384_v37 = vld [vmem:[%s1313_s11 + $0x1b0] sm:$0xff]  ;;  %v385_v38 = vld [vmem:[%s1313_s11 + $0x1b8] sm:$0xff]  ;;  %v952_v40 = vpack.c.bf16 %v367_v34, %v366_v33  ;;  %v922_v41 = vpack.c.bf16 %v353_v36, %v352_v35  ;;  %v1357_v48 = vld [vmem:[%s1513_s0] sm:$0xff] }
  0x44   : > { %v954_v42 = vpack.c.bf16 %v385_v38, %v384_v37  ;;  %v336_v43 = vld [vmem:[%s1313_s11 + $0x30] sm:$0xff]  ;;  %v337_v44 = vld [vmem:[%s1313_s11 + $0x38] sm:$0xff]  ;;  %v536_v49 = vld [vmem:[%s1515_s2] sm:$0xff]  ;;  %874 = vmatprep.mubr.f32.mxu0 %v1357_v48  ;;  %908 = vmatprep.mubr.f32.mxu1 %v1357_v48  ;;  %v548_v38 = vlaneseq }
  0x45   : > { %v368_v45 = vld [vmem:[%s1313_s11 + $0x130] sm:$0xff]  ;;  %v369_v47 = vld [vmem:[%s1313_s11 + $0x138] sm:$0xff]  ;;  %v354_v50 = vld [vmem:[%s1313_s11 + $0xc0] sm:$0xff]  ;;  %539 = vperm.xlu0 %1039, %v536_v49   ;;  %v924_v56 = vpack.c.bf16 %v337_v44, %v336_v43 }
  0x46   : > { %v355_v51 = vld [vmem:[%s1313_s11 + $0xc8] sm:$0xff]  ;;  %v646_v52 = vld [vmem:[%s1517_s4] sm:$0xff]  ;;  %v956_v57 = vpack.c.bf16 %v369_v47, %v368_v45  ;;  %v356_v0 = vld [vmem:[%s1313_s11 + $0xd0] sm:$0xff] }
  0x47   : > { %917 = vmatpush3.bf16.xpose.msra.mxu0 %v916_v27  ;;  %v386_v53 = vld [vmem:[%s1313_s11 + $0x1c0] sm:$0xff]  ;;  %v387_v54 = vld [vmem:[%s1313_s11 + $0x1c8] sm:$0xff]  ;;  %v648_v55 = vsub.s32 %v646_v52, %v647_v46  ;;  %v926_v58 = vpack.c.bf16 %v355_v51, %v354_v50  ;;  %v357_v1 = vld [vmem:[%s1313_s11 + $0xd8] sm:$0xff] }
  0x48   : > { %949 = vmatpush3.bf16.xpose.msra.mxu1 %v948_v28  ;;  %919 = vmatprep.subr.bf16.mxu0 %v918_v29  ;;  %v958_v59 = vpack.c.bf16 %v387_v54, %v386_v53  ;;  %v338_v60 = vld [vmem:[%s1313_s11 + $0x40] sm:$0xff]  ;;  %v339_v61 = vld [vmem:[%s1313_s11 + $0x48] sm:$0xff]  ;;  %v388_v2 = vld [vmem:[%s1313_s11 + $0x1d0] sm:$0xff]  ;;  %v930_v6 = vpack.c.bf16 %v357_v1, %v356_v0 }
  0x49   : > { %951 = vmatprep.subr.bf16.mxu1 %v950_v30  ;;  %650 = vperm.xlu0 %1039, %v648_v55   ;;  %v370_v62 = vld [vmem:[%s1313_s11 + $0x140] sm:$0xff]  ;;  %v371_v63 = vld [vmem:[%s1313_s11 + $0x148] sm:$0xff]  ;;  %v389_v3 = vld [vmem:[%s1313_s11 + $0x1d8] sm:$0xff]  ;;  %v928_v4 = vpack.c.bf16 %v339_v61, %v338_v60 }
  0x4a   : > { %v960_v5 = vpack.c.bf16 %v371_v63, %v370_v62  ;;  %v962_v7 = vpack.c.bf16 %v389_v3, %v388_v2  ;;  %v340_v8 = vld [vmem:[%s1313_s11 + $0x50] sm:$0xff]  ;;  %v341_v9 = vld [vmem:[%s1313_s11 + $0x58] sm:$0xff]  ;;  %v358_v12 = vld [vmem:[%s1313_s11 + $0xe0] sm:$0xff] }
  0x4b   : > { %v372_v10 = vld [vmem:[%s1313_s11 + $0x150] sm:$0xff]  ;;  %v373_v11 = vld [vmem:[%s1313_s11 + $0x158] sm:$0xff]  ;;  %v359_v13 = vld [vmem:[%s1313_s11 + $0xe8] sm:$0xff]  ;;  %v932_v16 = vpack.c.bf16 %v341_v9, %v340_v8  ;;  %v1421_v8 = vand.u32 127, %v548_v38 }
  0x4c   : > { %v390_v14 = vld [vmem:[%s1313_s11 + $0x1e0] sm:$0xff]  ;;  %v391_v15 = vld [vmem:[%s1313_s11 + $0x1e8] sm:$0xff]  ;;  %v964_v17 = vpack.c.bf16 %v373_v11, %v372_v10  ;;  %v934_v18 = vpack.c.bf16 %v359_v13, %v358_v12  ;;  %v360_v24 = vld [vmem:[%s1313_s11 + $0xf0] sm:$0xff] }
  0x4d   : > { %v966_v19 = vpack.c.bf16 %v391_v15, %v390_v14  ;;  %v342_v20 = vld [vmem:[%s1313_s11 + $0x60] sm:$0xff]  ;;  %v343_v21 = vld [vmem:[%s1313_s11 + $0x68] sm:$0xff]  ;;  %v361_v25 = vld [vmem:[%s1313_s11 + $0xf8] sm:$0xff]  ;;  %v644_v11 = vadd.s32 256, %v1421_v8 }
  0x4e   : > { %v374_v22 = vld [vmem:[%s1313_s11 + $0x160] sm:$0xff]  ;;  %v375_v23 = vld [vmem:[%s1313_s11 + $0x168] sm:$0xff]  ;;  %v392_v26 = vld [vmem:[%s1313_s11 + $0x1f0] sm:$0xff]  ;;  %v936_v28 = vpack.c.bf16 %v343_v21, %v342_v20  ;;  %v938_v30 = vpack.c.bf16 %v361_v25, %v360_v24 }
  0x4f   : > { %921 = vmatpush3.bf16.xpose.msra.mxu0 %v920_v39  ;;  %v393_v27 = vld [vmem:[%s1313_s11 + $0x1f8] sm:$0xff]  ;;  %v968_v29 = vpack.c.bf16 %v375_v23, %v374_v22  ;;  %v344_v32 = vld [vmem:[%s1313_s11 + $0x70] sm:$0xff]  ;;  %v549_v39 = vshrl.u32 %v548_v38, 7 }
  0x50   : > { %953 = vmatpush3.bf16.xpose.msra.mxu1 %v952_v40  ;;  %923 = vmatprep.subr.bf16.mxu0 %v922_v41  ;;  %v970_v31 = vpack.c.bf16 %v393_v27, %v392_v26  ;;  %v345_v33 = vld [vmem:[%s1313_s11 + $0x78] sm:$0xff]  ;;  %v376_v34 = vld [vmem:[%s1313_s11 + $0x170] sm:$0xff]  ;;  %v546_v41 = vld [vmem:[%s322_s27] sm:$0xf] }
  0x51   : > { %955 = vmatprep.subr.bf16.mxu1 %v954_v42  ;;  %v377_v35 = vld [vmem:[%s1313_s11 + $0x178] sm:$0xff]  ;;  %v940_v36 = vpack.c.bf16 %v345_v33, %v344_v32  ;;  %v550_v40 = vsub.s32 0, %v549_v39  ;;  %v558_v42 = vsub.s32 2, %v549_v39  ;;  %v554_v43 = vsub.s32 1, %v549_v39  ;;  %s681_s11 = sshll.u32 %s309_s10, 4  ;;  %s1466_s11 = int_to_ptr.vmem [resolvable:$true] %s681_s11 }
  0x52   : > { %v972_v37 = vpack.c.bf16 %v377_v35, %v376_v34  ;;  %v562_v52 = vsub.s32 3, %v549_v39  ;;  %s1078_s9 = scalar_lea.vmem %s1466_s11, 512  ;;  %p1085_p13 = scmp.lt.s32.totalorder %s1466_s11, %s1083_s30 }
  0x53   : > { %v551_v44 = vrot.slane %v546_v41, %v550_v40  ;;  %v559_v47 = vrot.slane %v546_v41, %v558_v42  ;;  %v555_v49 = vrot.slane %v546_v41, %v554_v43  ;;  %p1079_p9 = scmp.ne.s32.totalorder %s1466_s11, %s1078_s9  ;;  %p1086_p2 = scmp.lt.s32.totalorder %s1084_s12, %s1078_s9 }
  0x54   : > { %v563_v61 = vrot.slane %v546_v41, %v562_v52 }
  0x55   : > { %p1080_p0 = pnand %p1079_p9, %p1526_p11  ;;  %p1087_p5 = por %p1086_p2, %p1085_p13 }
  0x57   : > { %925 = vmatpush3.bf16.xpose.msra.mxu0 %v924_v56  ;;  %p1081_p6 = pneg %p1080_p0 }
  0x58   : > { %957 = vmatpush3.bf16.xpose.msra.mxu1 %v956_v57  ;;  %927 = vmatprep.subr.bf16.mxu0 %v926_v58 }
  0x59   : > { %959 = vmatprep.subr.bf16.mxu1 %v958_v59  ;;  %p1088_p4 = pnand %p1087_p5, %p1081_p6 }
  0x5f   : > { %929 = vmatpush3.bf16.xpose.msra.mxu0 %v928_v4 }
  0x60   : > { %961 = vmatpush3.bf16.xpose.msra.mxu1 %v960_v5  ;;  %931 = vmatprep.subr.bf16.mxu0 %v930_v6 }
  0x61   : > { %963 = vmatprep.subr.bf16.mxu1 %v962_v7 }
  0x67   : > { %933 = vmatpush3.bf16.xpose.msra.mxu0 %v932_v16  ;;  %v643_v16 = vadd.s32 128, %v1421_v8 }
  0x68   : > { %965 = vmatpush3.bf16.xpose.msra.mxu1 %v964_v17  ;;  %935 = vmatprep.subr.bf16.mxu0 %v934_v18 }
  0x69   : > { %967 = vmatprep.subr.bf16.mxu1 %v966_v19 }
  0x6f   : > { %937 = vmatpush3.bf16.xpose.msra.mxu0 %v936_v28 }
  0x70   : > { %969 = vmatpush3.bf16.xpose.msra.mxu1 %v968_v29  ;;  %939 = vmatprep.subr.bf16.mxu0 %v938_v30 }
  0x71   : > { %971 = vmatprep.subr.bf16.mxu1 %v970_v31 }
  0x77   : > { %941 = vmatpush3.bf16.xpose.msra.mxu0 %v940_v36 }
  0x78   : > { %973 = vmatpush3.bf16.xpose.msra.mxu1 %v972_v37 }
  0x7e   : > { %875 = vmatmul.mubr.f32.vlgmr.msra.gmra.mrb[0].mxu0 %v1357_v48 }
  0x7f   : > { %909 = vmatmul.mubr.f32.vlgmr.msra.gmra.mrb[0].mxu1 %v1357_v48 }
  0xc4   : > { %v540_v45 = vpop.permute.xlu0 %539 }
  0xc8   : > { %v1426_v12 = vpop.permute.xlu0 %650 }
  0xc9   : > { %vm652_vm0 = vcmp.eq.s32.totalorder %v1421_v8, %v1426_v12  ;;  %vm654_vm2 = vcmp.eq.s32.totalorder %v644_v11, %v1426_v12  ;;  %vm653_vm13 = vcmp.eq.s32.totalorder %v643_v16, %v1426_v12 }
 0x151   : > { %v460_v46 = vpop.f32.mrb[0].mxu0 }
 0x152   : > { %v542_v50 = vmul.f32 %v540_v45, %v460_v46  ;;  %v531_v48 = vpop.f32.mrb[0].mxu1  ;;  %v462_v51 = vpop.f32.mrb[1].mxu0 }
 0x153   : > { %v544_v53 = vmul.f32 %v540_v45, %v531_v48  ;;  %v543_v54 = vmul.f32 %v540_v45, %v462_v51  ;;  %v533_v55 = vpop.f32.mrb[1].mxu1 }
 0x154   : > { %v1405_v56 = vmul.f32 %v551_v44, %v542_v50  ;;  %v545_v60 = vmul.f32 %v540_v45, %v533_v55  ;;  %v645_v55 = vadd.s32 384, %v1421_v8 }
 0x155   : > { %v1407_v57 = vmul.f32 %v559_v47, %v544_v53  ;;  %v1409_v58 = vmul.f32 %v555_v49, %v543_v54 }
 0x156   : > { %v572_v59 = vmul.f32 %v1405_v56, %v1405_v56  ;;  %v1417_v4 = vmul.f32 %v563_v61, %v545_v60  ;;  %v612_v15 = vmul.f32 28.082642, %v1405_v56  ;;  %v624_v20 = vmul.f32 32.0, %v1405_v56 }
 0x157   : > { %v574_v62 = vmul.f32 %v1407_v57, %v1407_v57  ;;  %v573_v0 = vmul.f32 %v1409_v58, %v1409_v58  ;;  %v626_v26 = vmul.f32 32.0, %v1407_v57  ;;  %v614_v27 = vmul.f32 28.082642, %v1407_v57 }
 0x158   : > { %v576_v63 = vsub.f32 1.0, %v572_v59  ;;  %v575_v7 = vmul.f32 %v1417_v4, %v1417_v4  ;;  %v625_v33 = vmul.f32 32.0, %v1409_v58  ;;  %v830_v35 = vadd.f32 -7.670809, %v624_v20 }
 0x159   : > { %v578_v1 = vsub.f32 1.0, %v574_v62  ;;  %v577_v3 = vsub.f32 1.0, %v573_v0  ;;  %vm628_vm8 = vcmp.gt.f32.partialorder %v1405_v56, -0.87758255  ;;  %v832_v38 = vadd.f32 -7.670809, %v626_v26 }
 0x15a   : > { %v580_v2 = vmax.f32 %v576_v63, 0.0  ;;  %v579_v9 = vsub.f32 1.0, %v575_v7  ;;  %vm630_vm9 = vcmp.gt.f32.partialorder %v1407_v57, -0.87758255  ;;  %v613_v42 = vmul.f32 28.082642, %v1409_v58 }
 0x15b   : > { %v582_v5 = vmax.f32 %v578_v1, 0.0  ;;  %v581_v6 = vmax.f32 %v577_v3, 0.0  ;;  %v831_v46 = vadd.f32 -7.670809, %v625_v33  ;;  %vm629_vm11 = vcmp.gt.f32.partialorder %v1409_v58, -0.87758255 }
 0x15c   : > { %1040 = vrsqrt.f32 %v580_v2  ;;  %v1423_v10 = vmax.f32 %v579_v9, 0.0  ;;  %vm586_vm1 = vcmp.eq.f32.partialorder %v580_v2, inf  ;;  %v589_v18 = vand.u32 2147483648, %v580_v2 }
 0x15d   : > { %1042 = vrsqrt.f32 %v582_v5  ;;  %vm588_vm3 = vcmp.eq.f32.partialorder %v580_v2, 0.0  ;;  %vm600_vm4 = vcmp.eq.f32.partialorder %v582_v5, inf  ;;  %v603_v22 = vand.u32 2147483648, %v582_v5 }
 0x15e   : > { %1044 = vrsqrt.f32 %v581_v6  ;;  %vm602_vm5 = vcmp.eq.f32.partialorder %v582_v5, 0.0  ;;  %vm593_vm6 = vcmp.eq.f32.partialorder %v581_v6, inf  ;;  %v596_v32 = vand.u32 2147483648, %v581_v6 }
 0x15f   : > { %1046 = vrsqrt.f32 %v1423_v10  ;;  %vm595_vm7 = vcmp.eq.f32.partialorder %v581_v6, 0.0  ;;  %vm607_vm10 = vcmp.eq.f32.partialorder %v1423_v10, inf  ;;  %v610_v48 = vand.u32 2147483648, %v1423_v10 }
 0x160   : > { %vm609_vm12 = vcmp.eq.f32.partialorder %v1423_v10, 0.0  ;;  %v627_v52 = vmul.f32 32.0, %v1417_v4  ;;  %v615_v57 = vmul.f32 28.082642, %v1417_v4  ;;  %vm631_vm14 = vcmp.gt.f32.partialorder %v1417_v4, -0.87758255 }
 0x161   : > { %vm655_vm15 = vcmp.eq.s32.totalorder %v645_v55, %v1426_v12 }
 0x162   : > { %v833_v60 = vadd.f32 -7.670809, %v627_v52 }
 0x166   : > { %v1041_v13 = vpop.eup %1040 }
 0x167   : > { %v1043_v14 = vpop.eup %1042  ;;  %v585_v17 = vmul.f32 %v1041_v13, %v580_v2 }
 0x168   : > { %v599_v19 = vmul.f32 %v1043_v14, %v582_v5  ;;  %v1045_v23 = vpop.eup %1044 }
 0x169   : > { %v587_v21 = vsel %vm586_vm1, %v580_v2, %v585_v17  ;;  %v592_v30 = vmul.f32 %v1045_v23, %v581_v6  ;;  %v1047_v40 = vpop.eup %1046 }
 0x16a   : > { %v590_v24 = vsel %vm588_vm3, %v589_v18, %v587_v21  ;;  %v601_v25 = vsel %vm600_vm4, %v582_v5, %v599_v19  ;;  %v606_v47 = vmul.f32 %v1047_v40, %v1423_v10 }
 0x16b   : > { %v604_v28 = vsel %vm602_vm5, %v603_v22, %v601_v25  ;;  %v616_v29 = vmul.f32 15.341618, %v590_v24  ;;  %v594_v36 = vsel %vm593_vm6, %v581_v6, %v592_v30 }
 0x16c   : > { %v618_v31 = vmul.f32 15.341618, %v604_v28  ;;  %v597_v39 = vsel %vm595_vm7, %v596_v32, %v594_v36  ;;  %v608_v51 = vsel %vm607_vm10, %v1423_v10, %v606_v47 }
 0x16d   : > { %v620_v34 = vsub.f32 %v612_v15, %v616_v29  ;;  %v617_v43 = vmul.f32 15.341618, %v597_v39  ;;  %v611_v54 = vsel %vm609_vm12, %v610_v48, %v608_v51 }
 0x16e   : > { %v622_v37 = vsub.f32 %v614_v27, %v618_v31  ;;  %v619_v59 = vmul.f32 15.341618, %v611_v54 }
 0x16f   : > { %v636_v41 = vsel %vm628_vm8, %v620_v34, %v830_v35  ;;  %v621_v50 = vsub.f32 %v613_v42, %v617_v43 }
 0x170   : > { %v638_v44 = vsel %vm630_vm9, %v622_v37, %v832_v38  ;;  %v656_v45 = vsel %vm652_vm0, %v636_v41, %v624_v20  ;;  %v623_v58 = vsub.f32 %v615_v57, %v619_v59 }
 0x171   : > { %v658_v49 = vsel %vm654_vm2, %v638_v44, %v626_v26  ;;  %660 = vst [vmem:[%s309_s10] sm:$0xff] %v656_v45  ;;  %v637_v53 = vsel %vm629_vm11, %v621_v50, %v831_v46 }
 0x172   : > { %662 = vst [vmem:[%s309_s10 + $0x10] sm:$0xff] %v658_v49  ;;  %v657_v56 = vsel %vm653_vm13, %v637_v53, %v625_v33  ;;  %v639_v61 = vsel %vm631_vm14, %v623_v58, %v833_v60 }
 0x173   : > { %661 = vst [vmem:[%s309_s10 + $0x8] sm:$0xff] %v657_v56  ;;  %v659_v62 = vsel %vm655_vm15, %v639_v61, %v627_v52 }
 0x174   : > { %663 = vst [vmem:[%s309_s10 + $0x18] sm:$0xff] %v659_v62 }
 0x175   : > { %1091 = shalt.err (!%p1088_p4)
}
 0x176   : > { %s1092_s29 = scalar_lea.hbm %s1462_s17, 512  ;;  %s1096_s25 = scalar_lea.hbm %s1518_s5, 1024 }
 0x177   : > { %p1093_p7 = scmp.ne.s32.totalorder %s1462_s17, %s1092_s29  ;;  %p1097_p1 = scmp.lt.u32.totalorder %s1462_s17, %s1518_s5 }
 0x178   : > { %p1098_p3 = scmp.lt.u32.totalorder %s1096_s25, %s1092_s29  ;;  %p1100_p9 = scmp.lt.u32.totalorder %s1092_s29, %s1462_s17 }
 0x179   : > { %p1094_p10 = pnand %p1093_p7, %p1526_p11 }
 0x17a   : > { %p1099_p8 = por %p1098_p3, %p1097_p1 }
 0x17b   : > { %p1095_p12 = pneg %p1094_p10 }
 0x17c   : > { %p1101_p0 = por %p1100_p9, %p1099_p8 }
 0x17e   : > { %p1102_p6 = pnand %p1101_p0, %p1095_p12 }
 0x180   : > { %1105 = shalt.err (!%p1102_p6)
}
 0x181   : > { %976 = dma.vmem_to_hbm [thread:$0]  (%p1526_p11), %s1466_s11, 512, %s1462_s17, %s665_s24  }
 0x182 PF: > { %s693_s10 = sand.u32 1, %s1140_s18   ;;  %p1527_p13 = scmp.ne.s32.totalorder %s1523_s8, 0 }
 0x183   : > { %p1528_p2 = scmp.ge.s32.totalorder %s1160_s23, 2  ;;  %s694_s14 = scalar_lea.sflag [#allocation4], %s693_s10 }
 0x185   : > { %p983_p5 = pnand %p1528_p2, %p1527_p13 }
 0x187   : > { %1135 = dma.done.wait (!%p983_p5), %s694_s14, 512  }
 0x188   : > { %1137 = vsyncadd (!%p983_p5), %s694_s14, 4294966784  ;;  %s21_s23 = sadd.s32 1, %s1160_s23   ;;  %s1529_s18 = smov %s1144_s19 }
 0x189   : > { %p18_p4 = scmp.ge.s32.totalorder %s21_s23, 4   ;;  %s1530_s19 = smov %s1148_s20 }
 0x18a   : > { %s1531_s20 = smov %s1253_s7  ;;  %s1532_s21 = smov %s1156_s22 }
 0x18b   : > { %s1533_s22 = smov %s1535_s26  ;;  %20 = sbr.rel (!%p18_p4) target bundleno = 6 (0x6), region = 97 }
 0x192   :  { %699 = vsyncpa [#allocation3], 1 }
 0x193   :  { %701 = vsyncpa [#allocation3 + $0x1], 1 }
 0x194   :  { %702 = vsyncpa [#allocation4], 1 }
 0x195   :  { %704 = vsyncpa [#allocation4 + $0x1], 1 }

</bundles_post_ra>
